<compile_context>
chip_gen: v7x
topology: tpu7x:2x2x1
jax: 0.10.0
libtpu: 0.0.40
codegen_flags: <defaults>
</compile_context>

<pallas_src>
import functools

import jax
import jax.numpy as jnp
from jax import lax
from jax.experimental import pallas as pl
from jax.experimental.pallas import tpu as pltpu


# ----------------------------------------------------------------------------
# Pallas kernel: nn.MultiheadAttention(x, x, x) for a tile of Bt batch rows
# ----------------------------------------------------------------------------
def _mha_kernel(x_ref, w_in_t_ref, b_in_ref, w_out_ref, b_out_ref, o_ref,
                *, num_heads):
    bt, S, E = x_ref.shape
    H = num_heads
    Dh = E // H
    M = bt * S

    # Fused QKV projection with batch folded into M: (Bt*S, E) @ (E, 3E)
    x2d = x_ref[...].reshape(M, E).astype(jnp.bfloat16)
    qkv = jnp.dot(x2d, w_in_t_ref[...], preferred_element_type=jnp.float32)
    qkv = qkv + b_in_ref[...]                          # f32
    qkv3 = qkv.reshape(bt, S, 3 * E).astype(jnp.bfloat16)

    acc = jnp.zeros((M, E), jnp.float32)
    # TODO(synk): for large S / many heads, switch to lax.fori_loop with
    # flash-style KV tiling (running max/sum) to bound live (S,S) score tiles.
    for h in range(H):
        q0 = 0 * E + h * Dh
        k0 = 1 * E + h * Dh
        v0 = 2 * E + h * Dh
        qh = qkv3[:, :, q0:q0 + Dh]        # (Bt, S, Dh), Q pre-scaled at init
        kh = qkv3[:, :, k0:k0 + Dh]
        vh = qkv3[:, :, v0:v0 + Dh]

        # scores = qh @ kh^T per batch row (bf16 operands, f32 accumulate)
        s = jnp.einsum('bqd,bkd->bqk', qh, kh,
                       preferred_element_type=jnp.float32)         # (Bt,S,S)
        s = s - jnp.max(s, axis=-1, keepdims=True)                 # f32 softmax
        p = jnp.exp(s)
        inv = pl.reciprocal(jnp.sum(p, axis=-1, keepdims=True), approx=True)

        oh = jnp.einsum('bqk,bkd->bqd', p.astype(jnp.bfloat16), vh,
                        preferred_element_type=jnp.float32)        # (Bt,S,Dh)
        oh = (oh * inv).reshape(M, Dh).astype(jnp.bfloat16)

        # Accumulate directly into the output projection: no lane-axis concat.
        acc = acc + jnp.dot(oh, w_out_ref[h],            # (Dh, E) head block
                            preferred_element_type=jnp.float32)

    out = acc + b_out_ref[...]
    o_ref[...] = out.reshape(bt, S, E).astype(o_ref.dtype)


def mha_pallas(x, w_in_t, b_in, w_out_h, b_out, num_heads):
    """Self-attention (query=key=value=x), batched over the leading axis."""
    B, S, E = x.shape
    H = num_heads
    Dh = E // H

    # Fold as many batch rows as needed so M = Bt*S approaches the MXU pass
    # size; remaining batch tiles form a 'parallel' grid (feeds both v7x TCs
    # when B is large enough).
    bt = max(1, min(B, 256 // max(S, 1)))
    while B % bt:
        bt -= 1
    grid_b = B // bt

    flops = (2 * B * S * E * 3 * E          # QKV projection
             + 4 * B * H * S * S * Dh       # scores + PV
             + 2 * B * S * E * E)           # output projection
    transcendentals = B * H * S * S         # exp
    bytes_accessed = (4 * B * S * E * 2                       # x in + out (f32)
                      + grid_b * 2 * (3 * E * E + E * E)      # bf16 weights / step
                      + 4 * (3 * E + E))                      # biases
    cost = pl.CostEstimate(flops=flops, transcendentals=transcendentals,
                           bytes_accessed=bytes_accessed)

    kernel = functools.partial(_mha_kernel, num_heads=num_heads)
    # TODO(synk): on v7x with large E, single-buffer the constant weight
    # BlockSpecs (pipeline_mode=pl.Buffered(1)) to halve weight VMEM.
    # TODO(synk): if production E is not a multiple of 128, pad E so the
    # output stores are lane-dense (unmasked vst).
    return pl.pallas_call(
        kernel,
        out_shape=jax.ShapeDtypeStruct((B, S, E), x.dtype),
        grid_spec=pltpu.PrefetchScalarGridSpec(
            num_scalar_prefetch=0,
            grid=(grid_b,),
            in_specs=[
                pl.BlockSpec((bt, S, E), lambda b: (b, 0, 0)),    # x tile
                pl.BlockSpec((E, 3 * E), lambda b: (0, 0)),       # W_in^T (bf16)
                pl.BlockSpec((1, 3 * E), lambda b: (0, 0)),       # b_in (f32)
                pl.BlockSpec((H, Dh, E), lambda b: (0, 0, 0)),    # W_out^T per head (bf16)
                pl.BlockSpec((1, E), lambda b: (0, 0)),           # b_out (f32)
            ],
            out_specs=pl.BlockSpec((bt, S, E), lambda b: (b, 0, 0)),
        ),
        compiler_params=pltpu.CompilerParams(
            dimension_semantics=("parallel",),
            vmem_limit_bytes=32 * 1024 * 1024,
        ),
        cost_estimate=cost,
    )(x, w_in_t, b_in, w_out_h, b_out)


# ----------------------------------------------------------------------------
# Adaptive dopri5 integrator (torchdiffeq-style controller), plain JAX glue.
# The vector field f(y) is the Pallas attention kernel above (autonomous ODE).
# ----------------------------------------------------------------------------
_DOPRI5_A = (
    (1 / 5,),
    (3 / 40, 9 / 40),
    (44 / 45, -56 / 15, 32 / 9),
    (19372 / 6561, -25360 / 2187, 64448 / 6561, -212 / 729),
    (9017 / 3168, -355 / 33, 46732 / 5247, 49 / 176, -5103 / 18656),
    (35 / 384, 0.0, 500 / 1113, 125 / 192, -2187 / 6784, 11 / 84),
)
_DOPRI5_B = (35 / 384, 0.0, 500 / 1113, 125 / 192, -2187 / 6784, 11 / 84, 0.0)
_DOPRI5_BHAT = (5179 / 57600, 0.0, 7571 / 16695, 393 / 640,
                -92097 / 339200, 187 / 2100, 1 / 40)
_DOPRI5_ERR = tuple(b - bh for b, bh in zip(_DOPRI5_B, _DOPRI5_BHAT))


def odeint_dopri5(func, y0, t0, t1, rtol, atol):
    order = 5.0
    safety, ifactor, dfactor = 0.9, 10.0, 0.2

    def rms(x):
        return jnp.sqrt(jnp.mean(x * x))

    # TODO(synk): the y + h*sum(a*k) stage combinations could be fused into the
    # kernel prologue (pass stacked ks + coefficients) to cut per-stage HBM
    # round trips of the full activation tensor.
    def rk_step(y, f0, h):
        ks = [f0]
        for row in _DOPRI5_A:
            yi = y + h * sum(a * k for a, k in zip(row, ks))
            ks.append(func(yi))
        y_new = y + h * sum(b * k for b, k in zip(_DOPRI5_B[:6], ks[:6]))
        f_new = ks[6]                     # FSAL: last stage == f(y_new)
        err = h * sum(e * k for e, k in zip(_DOPRI5_ERR, ks))
        return y_new, f_new, err

    f0 = func(y0)
    # torchdiffeq-style initial step selection
    scale0 = atol + rtol * jnp.abs(y0)
    d0 = rms(y0 / scale0)
    d1 = rms(f0 / scale0)
    h0 = jnp.where((d0 < 1e-5) | (d1 < 1e-5), 1e-6, 0.01 * d0 / d1)
    y1 = y0 + h0 * f0
    f1 = func(y1)
    d2 = rms((f1 - f0) / scale0) / h0
    h1 = jnp.where((d1 <= 1e-15) & (d2 <= 1e-15),
                   jnp.maximum(1e-6, h0 * 1e-3),
                   (0.01 / jnp.maximum(d1, d2)) ** (1.0 / (order + 1.0)))
    h = jnp.minimum(100.0 * h0, h1)
    h = jnp.minimum(h, t1 - t0)

    def cond(state):
        t, _, _, _ = state
        return t < t1 - 1e-7

    def body(state):
        t, y, f_cur, h = state
        # TODO(synk): torchdiffeq steps past t1 and evaluates t=1 by 4th-order
        # dense interpolation; here we clamp the final step to land on t1
        # (difference is within the solver tolerance).
        h = jnp.minimum(h, t1 - t)
        y_new, f_new, err = rk_step(y, f_cur, h)
        err_scale = atol + rtol * jnp.maximum(jnp.abs(y), jnp.abs(y_new))
        err_norm = rms(err / err_scale)
        accept = err_norm <= 1.0
        # torchdiffeq _optimal_step_size controller
        dfac = jnp.where(err_norm < 1.0, 1.0, dfactor)
        factor = jnp.where(
            err_norm == 0.0, ifactor,
            jnp.minimum(ifactor,
                        jnp.maximum(safety / (err_norm ** (1.0 / order)), dfac)))
        h_next = h * factor
        t = jnp.where(accept, t + h, t)
        y = jnp.where(accept, y_new, y)
        f_cur = jnp.where(accept, f_new, f_cur)
        return (t, y, f_cur, h_next)

    _, y_final, _, _ = lax.while_loop(
        cond, body, (jnp.float32(t0), y0, f0, h))
    return y_final


# ----------------------------------------------------------------------------
# Module wrapper matching ODEMultiheadAttention
# ----------------------------------------------------------------------------
class ODEMultiheadAttentionPallas:
    def __init__(self, embed_dim, num_heads, tol=0.001, key=None):
        assert embed_dim % num_heads == 0
        self.embed_dim = embed_dim
        self.num_heads = num_heads
        self.tol = tol
        head_dim = embed_dim // num_heads
        k1, k2 = jax.random.split(key)
        # Deterministic init mirroring nn.MultiheadAttention._reset_parameters:
        # xavier_uniform in_proj_weight, zero biases; out_proj weight uniform.
        lim_in = (6.0 / (embed_dim + 3 * embed_dim)) ** 0.5
        w_in = jax.random.uniform(k1, (3 * embed_dim, embed_dim),
                                  jnp.float32, -lim_in, lim_in)
        lim_out = (1.0 / embed_dim) ** 0.5
        w_out = jax.random.uniform(k2, (embed_dim, embed_dim),
                                   jnp.float32, -lim_out, lim_out)

        # Fold the 1/sqrt(head_dim) attention scale into the Q projection
        # weights/bias once at init (constant fold on parameters).
        q_scale = 1.0 / (head_dim ** 0.5)
        w_in = w_in.at[:embed_dim, :].multiply(q_scale)
        b_in = jnp.zeros((1, 3 * embed_dim), jnp.float32)
        b_in = b_in.at[:, :embed_dim].multiply(q_scale)   # zeros; kept for clarity

        # bf16 weights: MXU-native rate, half the HBM bytes per RK stage.
        self.w_in_t = jnp.transpose(w_in).astype(jnp.bfloat16)      # (E, 3E)
        self.b_in = b_in                                            # (1, 3E) f32
        # out-proj weight pre-arranged as (H, Dh, E) so the kernel indexes
        # heads on a leading axis (no sub-128 lane slicing in the kernel).
        w_out_t = jnp.transpose(w_out)                              # (E, E)
        self.w_out_h = w_out_t.reshape(num_heads, head_dim,
                                       embed_dim).astype(jnp.bfloat16)
        self.b_out = jnp.zeros((1, embed_dim), jnp.float32)

    def __call__(self, x):
        func = lambda y: mha_pallas(y, self.w_in_t, self.b_in,
                                    self.w_out_h, self.b_out, self.num_heads)
        # odeint(..., t=[0, 1], method='dopri5')[-1]  ==  y(1)
        return odeint_dopri5(func, x, 0.0, 1.0, rtol=self.tol, atol=self.tol)


if __name__ == "__main__":
    B, S, E, H = 2, 8, 32, 4
    key = jax.random.PRNGKey(0)
    k_param, k_x = jax.random.split(key)

    model = ODEMultiheadAttentionPallas(embed_dim=E, num_heads=H,
                                        tol=0.001, key=k_param)
    x = jax.random.normal(k_x, (B, S, E), dtype=jnp.float32)

    run = jax.jit(model.__call__)
    out = run(x)
    jax.block_until_ready(out)
    assert out.shape == (B, S, E) and out.dtype == jnp.float32
    assert bool(jnp.all(jnp.isfinite(out)))
    print("KERNEL_OK")
</pallas_src>

<mosaic_0001>
module attributes {stable_mosaic.version = 11 : i64} {
  func.func @_mha_kernel(%arg0: i32, %arg1: memref<2x8x32xf32, #tpu.memory_space<vmem>>, %arg2: memref<32x96xbf16, #tpu.memory_space<vmem>>, %arg3: memref<1x96xf32, #tpu.memory_space<vmem>>, %arg4: memref<4x8x32xbf16, #tpu.memory_space<vmem>>, %arg5: memref<1x32xf32, #tpu.memory_space<vmem>>, %arg6: memref<2x8x32xf32, #tpu.memory_space<vmem>>) attributes {dimension_semantics = [#tpu.dimension_semantics<parallel>], iteration_bounds = array<i64: 1>, scalar_prefetch = 0 : i64, scratch_operands = 0 : i64, tpu.core_type = #tpu.core_type<tc>, window_params = [{transform_indices = @transform_0, window_bounds = array<i64: 2, 8, 32>}, {pipeline_mode = #tpu.pipeline_mode<synchronous>, transform_indices = @transform_1, window_bounds = array<i64: 32, 96>}, {pipeline_mode = #tpu.pipeline_mode<synchronous>, transform_indices = @transform_2, window_bounds = array<i64: 1, 96>}, {pipeline_mode = #tpu.pipeline_mode<synchronous>, transform_indices = @transform_3, window_bounds = array<i64: 4, 8, 32>}, {pipeline_mode = #tpu.pipeline_mode<synchronous>, transform_indices = @transform_4, window_bounds = array<i64: 1, 32>}, {transform_indices = @transform_5, window_bounds = array<i64: 2, 8, 32>}]} {
    %c0 = arith.constant 0 : index
    %c0_0 = arith.constant 0 : index
    %c0_1 = arith.constant 0 : index
    %0 = vector.load %arg1[%c0, %c0_0, %c0_1] : memref<2x8x32xf32, #tpu.memory_space<vmem>>, vector<2x8x32xf32>
    %1 = vector.shape_cast %0 : vector<2x8x32xf32> to vector<16x32xf32>
    %2 = arith.truncf %1 : vector<16x32xf32> to vector<16x32xbf16>
    %c0_2 = arith.constant 0 : index
    %c0_3 = arith.constant 0 : index
    %3 = vector.load %arg2[%c0_2, %c0_3] : memref<32x96xbf16, #tpu.memory_space<vmem>>, vector<32x96xbf16>
    %cst = arith.constant dense<0.000000e+00> : vector<16x96xf32>
    %4 = tpu.matmul %2, %3, %cst {dimension_numbers = #tpu.dot_dimension_numbers<[1], [0], [0], [1], [0, 0, 1, 1], [], []>} : vector<16x32xbf16>, vector<32x96xbf16>, vector<16x96xf32> -> vector<16x96xf32>
    %c0_4 = arith.constant 0 : index
    %c0_5 = arith.constant 0 : index
    %5 = vector.load %arg3[%c0_4, %c0_5] : memref<1x96xf32, #tpu.memory_space<vmem>>, vector<1x96xf32>
    %6 = vector.broadcast %5 : vector<1x96xf32> to vector<16x96xf32>
    %7 = arith.addf %4, %6 : vector<16x96xf32>
    %8 = vector.shape_cast %7 : vector<16x96xf32> to vector<2x8x96xf32>
    %9 = arith.truncf %8 : vector<2x8x96xf32> to vector<2x8x96xbf16>
    %cst_6 = arith.constant 0.000000e+00 : f32
    %10 = vector.broadcast %cst_6 : f32 to vector<16x32xf32>
    %11 = vector.extract_strided_slice %9 {offsets = [0, 0, 0], sizes = [2, 8, 8], strides = [1, 1, 1]} : vector<2x8x96xbf16> to vector<2x8x8xbf16>
    %12 = vector.extract_strided_slice %9 {offsets = [0, 0, 32], sizes = [2, 8, 8], strides = [1, 1, 1]} : vector<2x8x96xbf16> to vector<2x8x8xbf16>
    %13 = vector.extract_strided_slice %9 {offsets = [0, 0, 64], sizes = [2, 8, 8], strides = [1, 1, 1]} : vector<2x8x96xbf16> to vector<2x8x8xbf16>
    "tpu.trace_start"() <{level = 10 : i32, message = "bqd,bkd->bqk"}> : () -> ()
    %cst_7 = arith.constant dense<0.000000e+00> : vector<2x8x8xf32>
    %14 = tpu.matmul %11, %12, %cst_7 {dimension_numbers = #tpu.dot_dimension_numbers<[2], [2], [1], [1], [0, 0, 0, 1, 1, 1], [0], [0]>} : vector<2x8x8xbf16>, vector<2x8x8xbf16>, vector<2x8x8xf32> -> vector<2x8x8xf32>
    "tpu.trace_stop"() : () -> ()
    %cst_8 = arith.constant dense<0xFF800000> : vector<2x8xf32>
    %15 = vector.multi_reduction <maximumf>, %14, %cst_8 [2] : vector<2x8x8xf32> to vector<2x8xf32>
    %16 = vector.shape_cast %15 : vector<2x8xf32> to vector<2x8x1xf32>
    %17 = vector.broadcast %16 : vector<2x8x1xf32> to vector<2x8x8xf32>
    %18 = arith.subf %14, %17 : vector<2x8x8xf32>
    %19 = math.exp %18 : vector<2x8x8xf32>
    %cst_9 = arith.constant dense<0.000000e+00> : vector<2x8xf32>
    %20 = vector.multi_reduction <add>, %19, %cst_9 [2] : vector<2x8x8xf32> to vector<2x8xf32>
    %21 = vector.shape_cast %20 : vector<2x8xf32> to vector<2x8x1xf32>
    %22 = tpu.reciprocal %21 {approx = true} : vector<2x8x1xf32> -> vector<2x8x1xf32>
    %23 = arith.truncf %19 : vector<2x8x8xf32> to vector<2x8x8xbf16>
    "tpu.trace_start"() <{level = 10 : i32, message = "bqk,bkd->bqd"}> : () -> ()
    %cst_10 = arith.constant dense<0.000000e+00> : vector<2x8x8xf32>
    %24 = tpu.matmul %23, %13, %cst_10 {dimension_numbers = #tpu.dot_dimension_numbers<[2], [1], [1], [2], [0, 0, 0, 1, 1, 2], [0], [0]>} : vector<2x8x8xbf16>, vector<2x8x8xbf16>, vector<2x8x8xf32> -> vector<2x8x8xf32>
    "tpu.trace_stop"() : () -> ()
    %25 = vector.broadcast %22 : vector<2x8x1xf32> to vector<2x8x8xf32>
    %26 = arith.mulf %24, %25 : vector<2x8x8xf32>
    %27 = vector.shape_cast %26 : vector<2x8x8xf32> to vector<16x8xf32>
    %28 = arith.truncf %27 : vector<16x8xf32> to vector<16x8xbf16>
    %c0_11 = arith.constant 0 : index
    %c0_12 = arith.constant 0 : index
    %c0_13 = arith.constant 0 : index
    %29 = vector.load %arg4[%c0_11, %c0_12, %c0_13] : memref<4x8x32xbf16, #tpu.memory_space<vmem>>, vector<1x8x32xbf16>
    %30 = vector.shape_cast %29 : vector<1x8x32xbf16> to vector<8x32xbf16>
    %cst_14 = arith.constant dense<0.000000e+00> : vector<16x32xf32>
    %31 = tpu.matmul %28, %30, %cst_14 {dimension_numbers = #tpu.dot_dimension_numbers<[1], [0], [0], [1], [0, 0, 1, 1], [], []>} : vector<16x8xbf16>, vector<8x32xbf16>, vector<16x32xf32> -> vector<16x32xf32>
    %32 = arith.addf %10, %31 : vector<16x32xf32>
    %33 = vector.extract_strided_slice %9 {offsets = [0, 0, 8], sizes = [2, 8, 8], strides = [1, 1, 1]} : vector<2x8x96xbf16> to vector<2x8x8xbf16>
    %34 = vector.extract_strided_slice %9 {offsets = [0, 0, 40], sizes = [2, 8, 8], strides = [1, 1, 1]} : vector<2x8x96xbf16> to vector<2x8x8xbf16>
    %35 = vector.extract_strided_slice %9 {offsets = [0, 0, 72], sizes = [2, 8, 8], strides = [1, 1, 1]} : vector<2x8x96xbf16> to vector<2x8x8xbf16>
    "tpu.trace_start"() <{level = 10 : i32, message = "bqd,bkd->bqk"}> : () -> ()
    %cst_15 = arith.constant dense<0.000000e+00> : vector<2x8x8xf32>
    %36 = tpu.matmul %33, %34, %cst_15 {dimension_numbers = #tpu.dot_dimension_numbers<[2], [2], [1], [1], [0, 0, 0, 1, 1, 1], [0], [0]>} : vector<2x8x8xbf16>, vector<2x8x8xbf16>, vector<2x8x8xf32> -> vector<2x8x8xf32>
    "tpu.trace_stop"() : () -> ()
    %cst_16 = arith.constant dense<0xFF800000> : vector<2x8xf32>
    %37 = vector.multi_reduction <maximumf>, %36, %cst_16 [2] : vector<2x8x8xf32> to vector<2x8xf32>
    %38 = vector.shape_cast %37 : vector<2x8xf32> to vector<2x8x1xf32>
    %39 = vector.broadcast %38 : vector<2x8x1xf32> to vector<2x8x8xf32>
    %40 = arith.subf %36, %39 : vector<2x8x8xf32>
    %41 = math.exp %40 : vector<2x8x8xf32>
    %cst_17 = arith.constant dense<0.000000e+00> : vector<2x8xf32>
    %42 = vector.multi_reduction <add>, %41, %cst_17 [2] : vector<2x8x8xf32> to vector<2x8xf32>
    %43 = vector.shape_cast %42 : vector<2x8xf32> to vector<2x8x1xf32>
    %44 = tpu.reciprocal %43 {approx = true} : vector<2x8x1xf32> -> vector<2x8x1xf32>
    %45 = arith.truncf %41 : vector<2x8x8xf32> to vector<2x8x8xbf16>
    "tpu.trace_start"() <{level = 10 : i32, message = "bqk,bkd->bqd"}> : () -> ()
    %cst_18 = arith.constant dense<0.000000e+00> : vector<2x8x8xf32>
    %46 = tpu.matmul %45, %35, %cst_18 {dimension_numbers = #tpu.dot_dimension_numbers<[2], [1], [1], [2], [0, 0, 0, 1, 1, 2], [0], [0]>} : vector<2x8x8xbf16>, vector<2x8x8xbf16>, vector<2x8x8xf32> -> vector<2x8x8xf32>
    "tpu.trace_stop"() : () -> ()
    %47 = vector.broadcast %44 : vector<2x8x1xf32> to vector<2x8x8xf32>
    %48 = arith.mulf %46, %47 : vector<2x8x8xf32>
    %49 = vector.shape_cast %48 : vector<2x8x8xf32> to vector<16x8xf32>
    %50 = arith.truncf %49 : vector<16x8xf32> to vector<16x8xbf16>
    %c1 = arith.constant 1 : index
    %c0_19 = arith.constant 0 : index
    %c0_20 = arith.constant 0 : index
    %51 = vector.load %arg4[%c1, %c0_19, %c0_20] : memref<4x8x32xbf16, #tpu.memory_space<vmem>>, vector<1x8x32xbf16>
    %52 = vector.shape_cast %51 : vector<1x8x32xbf16> to vector<8x32xbf16>
    %cst_21 = arith.constant dense<0.000000e+00> : vector<16x32xf32>
    %53 = tpu.matmul %50, %52, %cst_21 {dimension_numbers = #tpu.dot_dimension_numbers<[1], [0], [0], [1], [0, 0, 1, 1], [], []>} : vector<16x8xbf16>, vector<8x32xbf16>, vector<16x32xf32> -> vector<16x32xf32>
    %54 = arith.addf %32, %53 : vector<16x32xf32>
    %55 = vector.extract_strided_slice %9 {offsets = [0, 0, 16], sizes = [2, 8, 8], strides = [1, 1, 1]} : vector<2x8x96xbf16> to vector<2x8x8xbf16>
    %56 = vector.extract_strided_slice %9 {offsets = [0, 0, 48], sizes = [2, 8, 8], strides = [1, 1, 1]} : vector<2x8x96xbf16> to vector<2x8x8xbf16>
    %57 = vector.extract_strided_slice %9 {offsets = [0, 0, 80], sizes = [2, 8, 8], strides = [1, 1, 1]} : vector<2x8x96xbf16> to vector<2x8x8xbf16>
    "tpu.trace_start"() <{level = 10 : i32, message = "bqd,bkd->bqk"}> : () -> ()
    %cst_22 = arith.constant dense<0.000000e+00> : vector<2x8x8xf32>
    %58 = tpu.matmul %55, %56, %cst_22 {dimension_numbers = #tpu.dot_dimension_numbers<[2], [2], [1], [1], [0, 0, 0, 1, 1, 1], [0], [0]>} : vector<2x8x8xbf16>, vector<2x8x8xbf16>, vector<2x8x8xf32> -> vector<2x8x8xf32>
    "tpu.trace_stop"() : () -> ()
    %cst_23 = arith.constant dense<0xFF800000> : vector<2x8xf32>
    %59 = vector.multi_reduction <maximumf>, %58, %cst_23 [2] : vector<2x8x8xf32> to vector<2x8xf32>
    %60 = vector.shape_cast %59 : vector<2x8xf32> to vector<2x8x1xf32>
    %61 = vector.broadcast %60 : vector<2x8x1xf32> to vector<2x8x8xf32>
    %62 = arith.subf %58, %61 : vector<2x8x8xf32>
    %63 = math.exp %62 : vector<2x8x8xf32>
    %cst_24 = arith.constant dense<0.000000e+00> : vector<2x8xf32>
    %64 = vector.multi_reduction <add>, %63, %cst_24 [2] : vector<2x8x8xf32> to vector<2x8xf32>
    %65 = vector.shape_cast %64 : vector<2x8xf32> to vector<2x8x1xf32>
    %66 = tpu.reciprocal %65 {approx = true} : vector<2x8x1xf32> -> vector<2x8x1xf32>
    %67 = arith.truncf %63 : vector<2x8x8xf32> to vector<2x8x8xbf16>
    "tpu.trace_start"() <{level = 10 : i32, message = "bqk,bkd->bqd"}> : () -> ()
    %cst_25 = arith.constant dense<0.000000e+00> : vector<2x8x8xf32>
    %68 = tpu.matmul %67, %57, %cst_25 {dimension_numbers = #tpu.dot_dimension_numbers<[2], [1], [1], [2], [0, 0, 0, 1, 1, 2], [0], [0]>} : vector<2x8x8xbf16>, vector<2x8x8xbf16>, vector<2x8x8xf32> -> vector<2x8x8xf32>
    "tpu.trace_stop"() : () -> ()
    %69 = vector.broadcast %66 : vector<2x8x1xf32> to vector<2x8x8xf32>
    %70 = arith.mulf %68, %69 : vector<2x8x8xf32>
    %71 = vector.shape_cast %70 : vector<2x8x8xf32> to vector<16x8xf32>
    %72 = arith.truncf %71 : vector<16x8xf32> to vector<16x8xbf16>
    %c2 = arith.constant 2 : index
    %c0_26 = arith.constant 0 : index
    %c0_27 = arith.constant 0 : index
    %73 = vector.load %arg4[%c2, %c0_26, %c0_27] : memref<4x8x32xbf16, #tpu.memory_space<vmem>>, vector<1x8x32xbf16>
    %74 = vector.shape_cast %73 : vector<1x8x32xbf16> to vector<8x32xbf16>
    %cst_28 = arith.constant dense<0.000000e+00> : vector<16x32xf32>
    %75 = tpu.matmul %72, %74, %cst_28 {dimension_numbers = #tpu.dot_dimension_numbers<[1], [0], [0], [1], [0, 0, 1, 1], [], []>} : vector<16x8xbf16>, vector<8x32xbf16>, vector<16x32xf32> -> vector<16x32xf32>
    %76 = arith.addf %54, %75 : vector<16x32xf32>
    %77 = vector.extract_strided_slice %9 {offsets = [0, 0, 24], sizes = [2, 8, 8], strides = [1, 1, 1]} : vector<2x8x96xbf16> to vector<2x8x8xbf16>
    %78 = vector.extract_strided_slice %9 {offsets = [0, 0, 56], sizes = [2, 8, 8], strides = [1, 1, 1]} : vector<2x8x96xbf16> to vector<2x8x8xbf16>
    %79 = vector.extract_strided_slice %9 {offsets = [0, 0, 88], sizes = [2, 8, 8], strides = [1, 1, 1]} : vector<2x8x96xbf16> to vector<2x8x8xbf16>
    "tpu.trace_start"() <{level = 10 : i32, message = "bqd,bkd->bqk"}> : () -> ()
    %cst_29 = arith.constant dense<0.000000e+00> : vector<2x8x8xf32>
    %80 = tpu.matmul %77, %78, %cst_29 {dimension_numbers = #tpu.dot_dimension_numbers<[2], [2], [1], [1], [0, 0, 0, 1, 1, 1], [0], [0]>} : vector<2x8x8xbf16>, vector<2x8x8xbf16>, vector<2x8x8xf32> -> vector<2x8x8xf32>
    "tpu.trace_stop"() : () -> ()
    %cst_30 = arith.constant dense<0xFF800000> : vector<2x8xf32>
    %81 = vector.multi_reduction <maximumf>, %80, %cst_30 [2] : vector<2x8x8xf32> to vector<2x8xf32>
    %82 = vector.shape_cast %81 : vector<2x8xf32> to vector<2x8x1xf32>
    %83 = vector.broadcast %82 : vector<2x8x1xf32> to vector<2x8x8xf32>
    %84 = arith.subf %80, %83 : vector<2x8x8xf32>
    %85 = math.exp %84 : vector<2x8x8xf32>
    %cst_31 = arith.constant dense<0.000000e+00> : vector<2x8xf32>
    %86 = vector.multi_reduction <add>, %85, %cst_31 [2] : vector<2x8x8xf32> to vector<2x8xf32>
    %87 = vector.shape_cast %86 : vector<2x8xf32> to vector<2x8x1xf32>
    %88 = tpu.reciprocal %87 {approx = true} : vector<2x8x1xf32> -> vector<2x8x1xf32>
    %89 = arith.truncf %85 : vector<2x8x8xf32> to vector<2x8x8xbf16>
    "tpu.trace_start"() <{level = 10 : i32, message = "bqk,bkd->bqd"}> : () -> ()
    %cst_32 = arith.constant dense<0.000000e+00> : vector<2x8x8xf32>
    %90 = tpu.matmul %89, %79, %cst_32 {dimension_numbers = #tpu.dot_dimension_numbers<[2], [1], [1], [2], [0, 0, 0, 1, 1, 2], [0], [0]>} : vector<2x8x8xbf16>, vector<2x8x8xbf16>, vector<2x8x8xf32> -> vector<2x8x8xf32>
    "tpu.trace_stop"() : () -> ()
    %91 = vector.broadcast %88 : vector<2x8x1xf32> to vector<2x8x8xf32>
    %92 = arith.mulf %90, %91 : vector<2x8x8xf32>
    %93 = vector.shape_cast %92 : vector<2x8x8xf32> to vector<16x8xf32>
    %94 = arith.truncf %93 : vector<16x8xf32> to vector<16x8xbf16>
    %c3 = arith.constant 3 : index
    %c0_33 = arith.constant 0 : index
    %c0_34 = arith.constant 0 : index
    %95 = vector.load %arg4[%c3, %c0_33, %c0_34] : memref<4x8x32xbf16, #tpu.memory_space<vmem>>, vector<1x8x32xbf16>
    %96 = vector.shape_cast %95 : vector<1x8x32xbf16> to vector<8x32xbf16>
    %cst_35 = arith.constant dense<0.000000e+00> : vector<16x32xf32>
    %97 = tpu.matmul %94, %96, %cst_35 {dimension_numbers = #tpu.dot_dimension_numbers<[1], [0], [0], [1], [0, 0, 1, 1], [], []>} : vector<16x8xbf16>, vector<8x32xbf16>, vector<16x32xf32> -> vector<16x32xf32>
    %98 = arith.addf %76, %97 : vector<16x32xf32>
    %c0_36 = arith.constant 0 : index
    %c0_37 = arith.constant 0 : index
    %99 = vector.load %arg5[%c0_36, %c0_37] : memref<1x32xf32, #tpu.memory_space<vmem>>, vector<1x32xf32>
    %100 = vector.broadcast %99 : vector<1x32xf32> to vector<16x32xf32>
    %101 = arith.addf %98, %100 : vector<16x32xf32>
    %102 = vector.shape_cast %101 : vector<16x32xf32> to vector<2x8x32xf32>
    %c0_38 = arith.constant 0 : index
    %c0_39 = arith.constant 0 : index
    %c0_40 = arith.constant 0 : index
    %103 = vector.load %arg6[%c0_38, %c0_39, %c0_40] : memref<2x8x32xf32, #tpu.memory_space<vmem>>, vector<2x8x32xf32>
    tpu.vector_store %arg6[%c0_38, %c0_39, %c0_40], %102 {strides = array<i32>} : memref<2x8x32xf32, #tpu.memory_space<vmem>>, vector<2x8x32xf32>,
    return
  }
  func.func @transform_0(%arg0: i32) -> (i32, i32, i32) {
    %c0_i32 = arith.constant 0 : i32
    %c0_i32_0 = arith.constant 0 : i32
    %c0_i32_1 = arith.constant 0 : i32
    return %arg0, %c0_i32, %c0_i32_0 : i32, i32, i32
  }
  func.func @transform_1(%arg0: i32) -> (i32, i32) {
    %c0_i32 = arith.constant 0 : i32
    %c0_i32_0 = arith.constant 0 : i32
    %c0_i32_1 = arith.constant 0 : i32
    return %c0_i32, %c0_i32_0 : i32, i32
  }
  func.func @transform_2(%arg0: i32) -> (i32, i32) {
    %c0_i32 = arith.constant 0 : i32
    %c0_i32_0 = arith.constant 0 : i32
    %c0_i32_1 = arith.constant 0 : i32
    return %c0_i32, %c0_i32_0 : i32, i32
  }
  func.func @transform_3(%arg0: i32) -> (i32, i32, i32) {
    %c0_i32 = arith.constant 0 : i32
    %c0_i32_0 = arith.constant 0 : i32
    %c0_i32_1 = arith.constant 0 : i32
    %c0_i32_2 = arith.constant 0 : i32
    return %c0_i32, %c0_i32_0, %c0_i32_1 : i32, i32, i32
  }
  func.func @transform_4(%arg0: i32) -> (i32, i32) {
    %c0_i32 = arith.constant 0 : i32
    %c0_i32_0 = arith.constant 0 : i32
    %c0_i32_1 = arith.constant 0 : i32
    return %c0_i32, %c0_i32_0 : i32, i32
  }
  func.func @transform_5(%arg0: i32) -> (i32, i32, i32) {
    %c0_i32 = arith.constant 0 : i32
    %c0_i32_0 = arith.constant 0 : i32
    %c0_i32_1 = arith.constant 0 : i32
    return %arg0, %c0_i32, %c0_i32_0 : i32, i32, i32
  }
}

</mosaic_0001>

<bundles_post_ra>
// kernel: a_call__.2
= control target key start
LH: loop header
LB: loop body
LE: loop exit
PB: predicated region body
PF: predicated region fallthrough
CT: control target
= control target key end

     0   :  { %v1438_v0 = vmov 0.0   ;;  %vm1439_vm0 = vmmov 0   ;;  %vm47_vm1 = vcmask 261120   ;;  %s1441_s27 = smov 64   ;;  %s1443_s28 = smov 120   ;;  %vm97_vm2 = vcmask 64512   ;;  %s1685_s1 = inlined_call_operand.vmem [shape: bf16[32,96], index: 1, kind: input, shape index: {}]   ;;  %s1686_s0 = inlined_call_operand.vmem [shape: f32[2,8,32], index: 0, kind: input, shape index: {}]   ;;  %s1687_s2 = inlined_call_operand.vmem [shape: f32[1,96], index: 2, kind: input, shape index: {}]   ;;  %s1688_s3 = inlined_call_operand.vmem [shape: bf16[4,8,32], index: 3, kind: input, shape index: {}]   ;;  %s1689_s4 = inlined_call_operand.vmem [shape: f32[1,32], index: 4, kind: input, shape index: {}]   ;;  %s1690_s5 = inlined_call_operand.vmem [shape: f32[2,8,32], index: 5, kind: output, shape index: {}]  }
   0x1   :  { %1263 = vmatprep.subr.bf16.mxu0 %v1438_v0  ;;  %v1404_v1 = vld [vmem:[%s1685_s1] sm:$0xff]   ;;  %1267 = vmatprep.mubr.msk.bf16.mxu0 %vm1439_vm0, %v1438_v0  ;;  %v1405_v2 = vld [vmem:[%s1685_s1 + $0x8] sm:$0xff]   ;;  %vm220_vm3 = vcmask 1043456   ;;  %s1444_s29 = smov 56   ;;  %s1445_s7 = smov 80  }
   0x2   :  { %1271 = vmatprep.subr.bf16.mxu1 %v1438_v0  ;;  %1273 = vmatprep.mubr.msk.bf16.mxu1 %vm1439_vm0, %v1438_v0  ;;  %v21_v3 = vld [vmem:[%s1686_s0] sm:$0xff]  ;;  %v22_v4 = vld [vmem:[%s1686_s0 + $0x8] sm:$0xff]  ;;  %s1440_s0 = smov 96   ;;  %s1446_s8 = smov 112  }
   0x3   :  { %1264 = vmatpush3.bf16.msra.mxu0 %v1404_v1  ;;  %v23_v5 = vpack.c.bf16 %v22_v4, %v21_v3  ;;  %v1192_v6 = vld [vmem:[%s1687_s2] ss:$0 sm:$0xff]  ;;  %s1442_s2 = smov 88   ;;  %s1447_s11 = smov 48  }
   0x4   :  { %1265 = vmatprep.subr.bf16.mxu0 %v1438_v0  ;;  %s1448_s12 = smov 72   ;;  %s1449_s13 = smov 104  }
   0x5   :  { %s1450_s16 = smov 40  }
   0x7   :  { %1266 = vmatpush3.bf16.msra.mxu0 %v1405_v2 }
   0x8   :  { %1277 = vmatprep.subr.bf16.mxu0 %v1438_v0 }
   0xa   :  { %1268 = vmatmul.mubr.msk.bf16.vlgmr.msra.gmra.mrb[0].mxu0 %vm47_vm1, %v23_v5 }
   0xb   :  { %1279 = vmatprep.mubr.msk.bf16.mxu0 %vm1439_vm0, %v1438_v0 }
  0xdd   :  { %v85_v7 = vpop.f32.mrb[0].mxu0 }
  0xde   :  { %v86_v8 = vadd.f32 %v1192_v6, %v85_v7  ;;  %v1269_v9 = vpop.f32.mrb[1].mxu0 }
  0xdf   :  { %v88_v10 = vpop.f32.mrb[2].mxu0 }
  0xe0   :  { %v1507_v11 = vpack.c.bf16 %v86_v8, %v86_v8  ;;  %v89_v12 = vadd.f32 %v1192_v6, %v88_v10  ;;  %v1270_v13 = vpop.f32.mrb[3].mxu0 }
  0xe2   :  { %95 = vrot.lane.b32.xlu0 %v1507_v11, %s1440_s0  ;;  %v1510_v14 = vpack.c.bf16 %v89_v12, %v89_v12 }
  0xe6   :  { %145 = vrot.lane.b32.xlu0 %v1510_v14, %s1440_s0 }
  0xea   :  { %215 = vrot.lane.b32.xlu0 %v1507_v11, %s1441_s27 }
  0xee   :  { %318 = vrot.lane.b32.xlu0 %v1507_v11, %s1442_s2 }
  0xf2   :  { %368 = vrot.lane.b32.xlu0 %v1510_v14, %s1442_s2 }
  0xf6   :  { %316 = vrot.lane.b32.xlu0 %v1507_v11, %s1443_s28 }
  0xfa   :  { %366 = vrot.lane.b32.xlu0 %v1510_v14, %s1443_s28 }
 0x154   :  { %v96_v15 = vpop.permute.xlu0 %95 }
 0x155   :  { %v102_v16 = vsel %vm97_vm2, %v96_v15, 0 }
 0x156   :  { %1272 = vmatpush3.bf16.xpose.msra.mxu1 %v102_v16 }
 0x157   :  { %1283 = vmatprep.subr.bf16.mxu1 %v1438_v0 }
 0x158   :  { %v146_v17 = vpop.permute.xlu0 %145 }
 0x159   :  { %v151_v18 = vsel %vm97_vm2, %v146_v17, 0 }
 0x15a   :  { %1278 = vmatpush3.bf16.xpose.msra.mxu0 %v151_v18 }
 0x15b   :  { %1289 = vmatprep.subr.bf16.mxu0 %v1438_v0 }
 0x15c   :  { %v216_v19 = vpop.permute.xlu0 %215 }
 0x15d   :  { %v222_v20 = vsel %vm220_vm3, %v216_v19, 0  ;;  %1274 = vmatmul.mubr.msk.bf16.vlgmr.msra.gmra.mrb[0].mxu1 %vm97_vm2, %v1507_v11 }
 0x15e   :  { %1284 = vmatpush3.bf16.msra.mxu1 %v222_v20  ;;  %1285 = vmatprep.mubr.msk.bf16.mxu1 %vm1439_vm0, %v1438_v0 }
 0x15f   :  { %1295 = vmatprep.subr.bf16.mxu1 %v1438_v0 }
 0x160   :  { %v319_v39 = vpop.permute.xlu0 %318 }
 0x161   :  { %1280 = vmatmul.mubr.msk.bf16.vlgmr.msra.gmra.mrb[4].mxu0 %vm97_vm2, %v1510_v14  ;;  %v324_v43 = vsel %vm97_vm2, %v319_v39, 0 }
 0x162   :  { %1291 = vmatprep.mubr.msk.bf16.mxu0 %vm1439_vm0, %v1438_v0 }
 0x164   :  { %v369_v42 = vpop.permute.xlu0 %368 }
 0x165   :  { %v374_v46 = vsel %vm97_vm2, %v369_v42, 0 }
 0x168   :  { %v317_v47 = vpop.permute.xlu0 %316 }
 0x16c   :  { %v367_v48 = vpop.permute.xlu0 %366 }
 0x230   :  { %v138_v21 = vpop.f32.mrb[0].mxu1 }
 0x231   :  { %v1275_v22 = vpop.f32.mrb[1].mxu1  ;;  %v193_v23 = vsel %vm97_vm2, %v138_v21, -inf }
 0x232   :  { %194 = vmax.xlane.f32.xlu1 %v193_v23  ;;  %v141_v24 = vpop.f32.mrb[2].mxu1 }
 0x233   :  { %v1276_v25 = vpop.f32.mrb[3].mxu1 }
 0x234   :  { %v187_v26 = vpop.f32.mrb[4].mxu0 }
 0x235   :  { %v1281_v27 = vpop.f32.mrb[5].mxu0  ;;  %v196_v28 = vsel %vm97_vm2, %v187_v26, -inf }
 0x236   :  { %197 = vmax.xlane.f32.xlu1 %v196_v28  ;;  %v190_v29 = vpop.f32.mrb[6].mxu0 }
 0x237   :  { %v1282_v30 = vpop.f32.mrb[7].mxu0 }
 0x247   :  { %264 = vrot.lane.b32.xlu1 %v1510_v14, %s1441_s27 }
 0x2bf   :  { %v195_v31 = vpop.xlane.xlu1 %194 }
 0x2c0   :  { %v199_v32 = vsub.f32 %v138_v21, %v195_v31  ;;  %v315_v21 = vld [vmem:[%s1688_s3] sm:$0xf] }
 0x2c1   :  { %v590_v25 = vsel %vm220_vm3, %v315_v21, 0 }
 0x2c2   :  { %v201_v33 = vmul.f32 1.442695, %v199_v32 }
 0x2c3   :  { %v198_v34 = vpop.xlane.xlu1 %197 }
 0x2c4   :  { %1406 = vpow2.f32 %v201_v33  ;;  %v200_v35 = vsub.f32 %v187_v26, %v198_v34  ;;  %v1204_v33 = vld [vmem:[%s1688_s3 + $0x4] sm:$0xf] }
 0x2c5   :  { %v543_v34 = vsel %vm220_vm3, %v1204_v33, 0 }
 0x2c6   :  { %v203_v36 = vmul.f32 1.442695, %v200_v35 }
 0x2c7   :  { %v265_v37 = vpop.permute.xlu1 %264 }
 0x2c8   :  { %1408 = vpow2.f32 %v203_v36  ;;  %v270_v38 = vsel %vm220_vm3, %v265_v37, 0 }
 0x2c9   :  { %1290 = vmatpush3.bf16.msra.mxu0 %v270_v38 }
 0x2ca   :  { %1301 = vmatprep.subr.bf16.mxu0 %v1438_v0 }
 0x2ce   :  { %v1407_v40 = vpop.eup %1406 }
 0x2cf   :  { %v213_v41 = vpack.c.bf16 %v1407_v40, %v1407_v40  ;;  %v205_v4 = vsel %vm97_vm2, %v1407_v40, 0.0 }
 0x2d1   :  { %1286 = vmatmul.mubr.msk.bf16.vlgmr.msra.gmra.mrb[4].mxu1 %vm97_vm2, %v213_v41 }
 0x2d2   :  { %v1409_v44 = vpop.eup %1408  ;;  %1296 = vmatpush3.bf16.xpose.msra.mxu1 %v324_v43  ;;  %1297 = vmatprep.mubr.msk.bf16.mxu1 %vm1439_vm0, %v1438_v0 }
 0x2d3   :  { %v214_v45 = vpack.c.bf16 %v1409_v44, %v1409_v44  ;;  %1307 = vmatprep.subr.bf16.mxu1 %v1438_v0  ;;  %v208_v5 = vsel %vm97_vm2, %v1409_v44, 0.0 }
 0x2d5   :  { %1292 = vmatmul.mubr.msk.bf16.vlgmr.msra.gmra.mrb[8].mxu0 %vm97_vm2, %v214_v45 }
 0x2d6   :  { %1302 = vmatpush3.bf16.xpose.msra.mxu0 %v374_v46  ;;  %1303 = vmatprep.mubr.msk.bf16.mxu0 %vm1439_vm0, %v1438_v0 }
 0x2d7   :  { %1313 = vmatprep.subr.bf16.mxu0 %v1438_v0 }
 0x2d9   :  { %1298 = vmatmul.mubr.msk.bf16.vlgmr.msra.gmra.mrb[8].mxu1 %vm97_vm2, %v317_v47 }
 0x2da   :  { %1309 = vmatprep.mubr.msk.bf16.mxu1 %vm1439_vm0, %v1438_v0 }
 0x2dd   :  { %1304 = vmatmul.mubr.msk.bf16.vlgmr.msra.gmra.mrb[12].mxu0 %vm97_vm2, %v367_v48 }
 0x2de   :  { %1315 = vmatprep.mubr.msk.bf16.mxu0 %vm1439_vm0, %v1438_v0 }
 0x3a4   :  { %v1555_v49 = vpop.f32.mrb[4].mxu1 }
 0x3a5   :  { %v1287_v50 = vpop.f32.mrb[5].mxu1 }
 0x3a6   :  { %v261_v51 = vpop.f32.mrb[6].mxu1 }
 0x3a7   :  { %v1288_v52 = vpop.f32.mrb[7].mxu1 }
 0x3a8   :  { %v1557_v53 = vpop.f32.mrb[8].mxu0 }
 0x3a9   :  { %v1293_v54 = vpop.f32.mrb[9].mxu0 }
 0x3aa   :  { %v309_v55 = vpop.f32.mrb[10].mxu0 }
 0x3ab   :  { %v1294_v56 = vpop.f32.mrb[11].mxu0 }
 0x3ac   :  { %v360_v57 = vpop.f32.mrb[8].mxu1 }
 0x3ad   :  { %v1299_v58 = vpop.f32.mrb[9].mxu1  ;;  %v416_v59 = vsel %vm97_vm2, %v360_v57, -inf }
 0x3ae   :  { %v363_v60 = vpop.f32.mrb[10].mxu1  ;;  %417 = vmax.xlane.f32.xlu1 %v416_v59 }
 0x3af   :  { %v1300_v61 = vpop.f32.mrb[11].mxu1 }
 0x3b0   :  { %v410_v62 = vpop.f32.mrb[12].mxu0 }
 0x3b1   :  { %v1305_v63 = vpop.f32.mrb[13].mxu0  ;;  %v419_v1 = vsel %vm97_vm2, %v410_v62, -inf }
 0x3b2   :  { %420 = vmax.xlane.f32.xlu0 %v419_v1  ;;  %v413_v2 = vpop.f32.mrb[14].mxu0 }
 0x3b3   :  { %v1306_v3 = vpop.f32.mrb[15].mxu0 }
 0x3bf   :  { %486 = vrot.lane.b32.xlu1 %v1510_v14, %s1444_s29 }
 0x3c8   :  { %438 = vrot.lane.b32.xlu0 %v1507_v11, %s1444_s29 }
 0x3e3   :  { %206 = vadd.xlane.f32.xlu1 %v205_v4 }
 0x3e7   :  { %209 = vadd.xlane.f32.xlu0 %v208_v5 }
 0x43b   :  { %v418_v6 = vpop.xlane.xlu1 %417 }
 0x43c   :  { %v422_v7 = vsub.f32 %v360_v57, %v418_v6 }
 0x43e   :  { %v424_v8 = vmul.f32 1.442695, %v422_v7 }
 0x43f   :  { %v487_v9 = vpop.permute.xlu1 %486  ;;  %v421_v10 = vpop.xlane.xlu0 %420 }
 0x440   :  { %1410 = vpow2.f32 %v424_v8  ;;  %v492_v12 = vsel %vm220_vm3, %v487_v9, 0  ;;  %v423_v13 = vsub.f32 %v410_v62, %v421_v10 }
 0x441   :  { %1314 = vmatpush3.bf16.msra.mxu0 %v492_v12 }
 0x442   :  { %v426_v15 = vmul.f32 1.442695, %v423_v13  ;;  %1325 = vmatprep.subr.bf16.mxu0 %v1438_v0 }
 0x443   :  { %v439_v16 = vpop.permute.xlu0 %438 }
 0x444   :  { %1412 = vpow2.f32 %v426_v15  ;;  %v444_v17 = vsel %vm220_vm3, %v439_v16, 0 }
 0x445   :  { %1308 = vmatpush3.bf16.msra.mxu1 %v444_v17 }
 0x446   :  { %1319 = vmatprep.subr.bf16.mxu1 %v1438_v0 }
 0x44a   :  { %v1411_v18 = vpop.eup %1410 }
 0x44b   :  { %v428_v19 = vsel %vm97_vm2, %v1411_v18, 0.0  ;;  %v436_v20 = vpack.c.bf16 %v1411_v18, %v1411_v18 }
 0x44c   :  { %429 = vadd.xlane.f32.xlu0 %v428_v19 }
 0x44d   :  { %1310 = vmatmul.mubr.msk.bf16.vlgmr.msra.gmra.mrb[12].mxu1 %vm97_vm2, %v436_v20 }
 0x44e   :  { %v1413_v22 = vpop.eup %1412  ;;  %1321 = vmatprep.mubr.msk.bf16.mxu1 %vm1439_vm0, %v1438_v0  ;;  %1320 = vmatpush3.bf16.msra.mxu1 %v543_v34  ;;  %v1211_v34 = vld [vmem:[%s1688_s3 + $0x8] sm:$0xf] }
 0x44f   :  { %v431_v23 = vsel %vm97_vm2, %v1413_v22, 0.0  ;;  %v437_v24 = vpack.c.bf16 %v1413_v22, %v1413_v22  ;;  %1331 = vmatprep.subr.bf16.mxu1 %v1438_v0 }
 0x450   :  { %432 = vadd.xlane.f32.xlu1 %v431_v23 }
 0x451   :  { %1316 = vmatmul.mubr.msk.bf16.vlgmr.msra.gmra.mrb[16].mxu0 %vm97_vm2, %v437_v24 }
 0x452   :  { %1326 = vmatpush3.bf16.msra.mxu0 %v590_v25  ;;  %1327 = vmatprep.mubr.msk.bf16.mxu0 %vm1439_vm0, %v1438_v0 }
 0x453   :  { %1337 = vmatprep.subr.bf16.mxu0 %v1438_v0 }
 0x461   :  { %685 = vrot.lane.b32.xlu1 %v1510_v14, %s1445_s7 }
 0x462   :  { %635 = vrot.lane.b32.xlu0 %v1507_v11, %s1445_s7 }
 0x465   :  { %633 = vrot.lane.b32.xlu1 %v1507_v11, %s1446_s8 }
 0x466   :  { %683 = vrot.lane.b32.xlu0 %v1510_v14, %s1446_s8 }
 0x470   :  { %v207_v26 = vpop.xlane.xlu1 %206 }
 0x471   :  { %1414 = vrcp.f32 %v207_v26 }
 0x474   :  { %v210_v27 = vpop.xlane.xlu0 %209 }
 0x475   :  { %1416 = vrcp.f32 %v210_v27 }
 0x47b   :  { %v1415_v28 = vpop.eup %1414 }
 0x47c   :  { %v312_v30 = vmul.f32 %v1415_v28, %v1555_v49 }
 0x47f   :  { %v1417_v29 = vpop.eup %1416 }
 0x480   :  { %v313_v31 = vmul.f32 %v1417_v29, %v1557_v53 }
 0x482   :  { %v314_v32 = vpack.c.bf16 %v313_v31, %v312_v30 }
 0x484   :  { %1328 = vmatmul.mubr.msk.bf16.vlgmr.msra.gmra.mrb[20].mxu0 %vm97_vm2, %v314_v32 }
 0x485   :  { %1339 = vmatprep.mubr.msk.bf16.mxu0 %vm1439_vm0, %v1438_v0 }
 0x4d9   :  { %v430_v35 = vpop.xlane.xlu0 %429 }
 0x4da   :  { %1418 = vrcp.f32 %v430_v35  ;;  %v860_v35 = vsel %vm220_vm3, %v1211_v34, 0 }
 0x4dd   :  { %v433_v36 = vpop.xlane.xlu1 %432  ;;  %v636_v39 = vpop.permute.xlu0 %635 }
 0x4de   :  { %1420 = vrcp.f32 %v433_v36  ;;  %v641_v54 = vsel %vm97_vm2, %v636_v39, 0 }
 0x4e1   :  { %v686_v37 = vpop.permute.xlu1 %685  ;;  %v684_v40 = vpop.permute.xlu0 %683 }
 0x4e2   :  { %v691_v38 = vsel %vm97_vm2, %v686_v37, 0 }
 0x4e3   :  { %1338 = vmatpush3.bf16.xpose.msra.mxu0 %v691_v38 }
 0x4e4   :  { %1349 = vmatprep.subr.bf16.mxu0 %v1438_v0  ;;  %v1419_v44 = vpop.eup %1418 }
 0x4e5   :  { %v634_v55 = vpop.permute.xlu1 %633 }
 0x4e8   :  { %v1421_v46 = vpop.eup %1420 }
 0x4ea   :  { %1340 = vmatmul.mubr.msk.bf16.vlgmr.msra.gmra.mrb[24].mxu0 %vm97_vm2, %v684_v40 }
 0x4eb   :  { %1351 = vmatprep.mubr.msk.bf16.mxu0 %vm1439_vm0, %v1438_v0 }
 0x520   :  { %v480_v41 = vpop.f32.mrb[12].mxu1 }
 0x521   :  { %v1311_v42 = vpop.f32.mrb[13].mxu1  ;;  %v534_v48 = vmul.f32 %v1419_v44, %v480_v41 }
 0x522   :  { %v483_v43 = vpop.f32.mrb[14].mxu1 }
 0x523   :  { %v1312_v45 = vpop.f32.mrb[15].mxu1 }
 0x524   :  { %v528_v47 = vpop.f32.mrb[16].mxu0 }
 0x525   :  { %v535_v49 = vmul.f32 %v1421_v46, %v528_v47  ;;  %v1317_v50 = vpop.f32.mrb[17].mxu0 }
 0x526   :  { %v531_v51 = vpop.f32.mrb[18].mxu0 }
 0x527   :  { %v536_v52 = vpack.c.bf16 %v535_v49, %v534_v48  ;;  %v1318_v53 = vpop.f32.mrb[19].mxu0 }
 0x529   :  { %1322 = vmatmul.mubr.msk.bf16.vlgmr.msra.gmra.mrb[16].mxu1 %vm97_vm2, %v536_v52 }
 0x52a   :  { %1332 = vmatpush3.bf16.xpose.msra.mxu1 %v641_v54  ;;  %1333 = vmatprep.mubr.msk.bf16.mxu1 %vm1439_vm0, %v1438_v0 }
 0x52b   :  { %1343 = vmatprep.subr.bf16.mxu1 %v1438_v0 }
 0x531   :  { %1334 = vmatmul.mubr.msk.bf16.vlgmr.msra.gmra.mrb[20].mxu1 %vm97_vm2, %v634_v55 }
 0x532   :  { %1345 = vmatprep.mubr.msk.bf16.mxu1 %vm1439_vm0, %v1438_v0 }
 0x557   :  { %v626_v56 = vpop.f32.mrb[20].mxu0 }
 0x558   :  { %v1329_v57 = vpop.f32.mrb[21].mxu0 }
 0x559   :  { %v629_v58 = vpop.f32.mrb[22].mxu0 }
 0x55a   :  { %v1330_v59 = vpop.f32.mrb[23].mxu0 }
 0x5bd   :  { %v727_v60 = vpop.f32.mrb[24].mxu0 }
 0x5be   :  { %v1341_v61 = vpop.f32.mrb[25].mxu0  ;;  %v736_v62 = vsel %vm97_vm2, %v727_v60, -inf }
 0x5bf   :  { %737 = vmax.xlane.f32.xlu0 %v736_v62  ;;  %v730_v63 = vpop.f32.mrb[26].mxu0 }
 0x5c0   :  { %v1342_v1 = vpop.f32.mrb[27].mxu0 }
 0x5d5   :  { %755 = vrot.lane.b32.xlu0 %v1507_v11, %s1447_s11 }
 0x5fc   :  { %v579_v2 = vpop.f32.mrb[16].mxu1 }
 0x5fd   :  { %v1611_v3 = vadd.f32 %v626_v56, %v579_v2  ;;  %v1323_v4 = vpop.f32.mrb[17].mxu1 }
 0x5fe   :  { %v582_v5 = vpop.f32.mrb[18].mxu1 }
 0x5ff   :  { %v1613_v6 = vadd.f32 %v629_v58, %v582_v5  ;;  %v1324_v7 = vpop.f32.mrb[19].mxu1 }
 0x604   :  { %v677_v8 = vpop.f32.mrb[20].mxu1 }
 0x605   :  { %v1335_v9 = vpop.f32.mrb[21].mxu1  ;;  %v733_v10 = vsel %vm97_vm2, %v677_v8, -inf }
 0x606   :  { %734 = vmax.xlane.f32.xlu1 %v733_v10  ;;  %v680_v12 = vpop.f32.mrb[22].mxu1 }
 0x607   :  { %v1336_v13 = vpop.f32.mrb[23].mxu1 }
 0x617   :  { %803 = vrot.lane.b32.xlu1 %v1510_v14, %s1447_s11 }
 0x64c   :  { %v738_v15 = vpop.xlane.xlu0 %737 }
 0x64d   :  { %v740_v16 = vsub.f32 %v727_v60, %v738_v15 }
 0x64f   :  { %v743_v17 = vmul.f32 1.442695, %v740_v16 }
 0x650   :  { %v756_v18 = vpop.permute.xlu0 %755 }
 0x651   :  { %1422 = vpow2.f32 %v743_v17  ;;  %v761_v19 = vsel %vm220_vm3, %v756_v18, 0 }
 0x652   :  { %1344 = vmatpush3.bf16.msra.mxu1 %v761_v19 }
 0x653   :  { %1355 = vmatprep.subr.bf16.mxu1 %v1438_v0 }
 0x65b   :  { %v1423_v20 = vpop.eup %1422 }
 0x65c   :  { %v748_v21 = vsel %vm97_vm2, %v1423_v20, 0.0  ;;  %v754_v27 = vpack.c.bf16 %v1423_v20, %v1423_v20 }
 0x65d   :  { %749 = vadd.xlane.f32.xlu0 %v748_v21 }
 0x673   :  { %907 = vrot.lane.b32.xlu0 %v1507_v11, %s1448_s12 }
 0x677   :  { %955 = vrot.lane.b32.xlu0 %v1510_v14, %s1449_s13 }
 0x693   :  { %v735_v22 = vpop.xlane.xlu1 %734 }
 0x694   :  { %v739_v23 = vsub.f32 %v677_v8, %v735_v22 }
 0x696   :  { %v741_v24 = vmul.f32 1.442695, %v739_v23  ;;  %v1217_v23 = vld [vmem:[%s1688_s3 + $0xc] sm:$0xf] }
 0x697   :  { %v804_v25 = vpop.permute.xlu1 %803 }
 0x698   :  { %1424 = vpow2.f32 %v741_v24  ;;  %v809_v26 = vsel %vm220_vm3, %v804_v25, 0  ;;  %v1132_v24 = vsel %vm220_vm3, %v1217_v23, 0 }
 0x699   :  { %1350 = vmatpush3.bf16.msra.mxu0 %v809_v26 }
 0x69a   :  { %1361 = vmatprep.subr.bf16.mxu0 %v1438_v0 }
 0x69c   :  { %1352 = vmatmul.mubr.msk.bf16.vlgmr.msra.gmra.mrb[28].mxu0 %vm97_vm2, %v754_v27 }
 0x69d   :  { %1363 = vmatprep.mubr.msk.bf16.mxu0 %vm1439_vm0, %v1438_v0 }
 0x6a2   :  { %v1425_v28 = vpop.eup %1424 }
 0x6a3   :  { %v745_v29 = vsel %vm97_vm2, %v1425_v28, 0.0  ;;  %v753_v30 = vpack.c.bf16 %v1425_v28, %v1425_v28 }
 0x6a4   :  { %746 = vadd.xlane.f32.xlu1 %v745_v29 }
 0x6a5   :  { %1346 = vmatmul.mubr.msk.bf16.vlgmr.msra.gmra.mrb[24].mxu1 %vm97_vm2, %v753_v30 }
 0x6a6   :  { %1357 = vmatprep.mubr.msk.bf16.mxu1 %vm1439_vm0, %v1438_v0  ;;  %1356 = vmatpush3.bf16.msra.mxu1 %v860_v35 }
 0x6a7   :  { %1367 = vmatprep.subr.bf16.mxu1 %v1438_v0 }
 0x6b5   :  { %957 = vrot.lane.b32.xlu1 %v1510_v14, %s1448_s12 }
 0x6b9   :  { %905 = vrot.lane.b32.xlu1 %v1507_v11, %s1449_s13 }
 0x6ea   :  { %v750_v31 = vpop.xlane.xlu0 %749 }
 0x6eb   :  { %1426 = vrcp.f32 %v750_v31 }
 0x6ee   :  { %v908_v32 = vpop.permute.xlu0 %907 }
 0x6ef   :  { %v913_v33 = vsel %vm97_vm2, %v908_v32, 0 }
 0x6f0   :  { %1362 = vmatpush3.bf16.xpose.msra.mxu0 %v913_v33 }
 0x6f1   :  { %1373 = vmatprep.subr.bf16.mxu0 %v1438_v0 }
 0x6f2   :  { %v956_v53 = vpop.permute.xlu0 %955 }
 0x6f5   :  { %v1427_v39 = vpop.eup %1426 }
 0x731   :  { %v747_v36 = vpop.xlane.xlu1 %746 }
 0x732   :  { %1428 = vrcp.f32 %v747_v36 }
 0x735   :  { %v958_v37 = vpop.permute.xlu1 %957 }
 0x736   :  { %v963_v52 = vsel %vm97_vm2, %v958_v37, 0 }
 0x739   :  { %v906_v38 = vpop.permute.xlu1 %905 }
 0x73a   :  { %1364 = vmatmul.mubr.msk.bf16.vlgmr.msra.gmra.mrb[32].mxu0 %vm97_vm2, %v906_v38 }
 0x73b   :  { %1375 = vmatprep.mubr.msk.bf16.mxu0 %vm1439_vm0, %v1438_v0 }
 0x73c   :  { %v1429_v45 = vpop.eup %1428 }
 0x76f   :  { %v845_v40 = vpop.f32.mrb[28].mxu0 }
 0x770   :  { %v852_v41 = vmul.f32 %v1427_v39, %v845_v40  ;;  %v1353_v42 = vpop.f32.mrb[29].mxu0  ;;  %v1219_v40 = vld [vmem:[%s1689_s4] ss:$0 sm:$0xff] }
 0x771   :  { %v848_v43 = vpop.f32.mrb[30].mxu0 }
 0x772   :  { %v1354_v44 = vpop.f32.mrb[31].mxu0 }
 0x778   :  { %v797_v46 = vpop.f32.mrb[24].mxu1 }
 0x779   :  { %v851_v47 = vmul.f32 %v1429_v45, %v797_v46  ;;  %v1347_v48 = vpop.f32.mrb[25].mxu1 }
 0x77a   :  { %v800_v49 = vpop.f32.mrb[26].mxu1 }
 0x77b   :  { %v853_v50 = vpack.c.bf16 %v852_v41, %v851_v47  ;;  %v1348_v51 = vpop.f32.mrb[27].mxu1 }
 0x77d   :  { %1358 = vmatmul.mubr.msk.bf16.vlgmr.msra.gmra.mrb[28].mxu1 %vm97_vm2, %v853_v50 }
 0x77e   :  { %1368 = vmatpush3.bf16.xpose.msra.mxu1 %v963_v52  ;;  %1369 = vmatprep.mubr.msk.bf16.mxu1 %vm1439_vm0, %v1438_v0 }
 0x77f   :  { %1379 = vmatprep.subr.bf16.mxu1 %v1438_v0 }
 0x785   :  { %1370 = vmatmul.mubr.msk.bf16.vlgmr.msra.gmra.mrb[32].mxu1 %vm97_vm2, %v956_v53 }
 0x786   :  { %1381 = vmatprep.mubr.msk.bf16.mxu1 %vm1439_vm0, %v1438_v0 }
 0x80d   :  { %v949_v54 = vpop.f32.mrb[32].mxu0 }
 0x80e   :  { %v1365_v55 = vpop.f32.mrb[33].mxu0  ;;  %v1005_v56 = vsel %vm97_vm2, %v949_v54, -inf }
 0x80f   :  { %1006 = vmax.xlane.f32.xlu1 %v1005_v56  ;;  %v952_v57 = vpop.f32.mrb[34].mxu0 }
 0x810   :  { %v1366_v58 = vpop.f32.mrb[35].mxu0 }
 0x820   :  { %1075 = vrot.lane.b32.xlu1 %v1510_v14, %s1450_s16 }
 0x850   :  { %v896_v59 = vpop.f32.mrb[28].mxu1 }
 0x851   :  { %v903_v60 = vadd.f32 %v896_v59, %v1611_v3  ;;  %v1359_v61 = vpop.f32.mrb[29].mxu1 }
 0x852   :  { %v899_v62 = vpop.f32.mrb[30].mxu1 }
 0x853   :  { %v1655_v63 = vadd.f32 %v899_v62, %v1613_v6  ;;  %v1360_v1 = vpop.f32.mrb[31].mxu1 }
 0x858   :  { %v999_v2 = vpop.f32.mrb[32].mxu1 }
 0x859   :  { %v1371_v4 = vpop.f32.mrb[33].mxu1  ;;  %v1008_v5 = vsel %vm97_vm2, %v999_v2, -inf }
 0x85a   :  { %1009 = vmax.xlane.f32.xlu0 %v1008_v5  ;;  %v1002_v7 = vpop.f32.mrb[34].mxu1 }
 0x85b   :  { %v1372_v8 = vpop.f32.mrb[35].mxu1 }
 0x870   :  { %1027 = vrot.lane.b32.xlu0 %v1507_v11, %s1450_s16 }
 0x89c   :  { %v1007_v9 = vpop.xlane.xlu1 %1006 }
 0x89d   :  { %v1011_v14 = vsub.f32 %v949_v54, %v1007_v9 }
 0x89f   :  { %v1013_v10 = vmul.f32 1.442695, %v1011_v14 }
 0x8a0   :  { %v1076_v12 = vpop.permute.xlu1 %1075 }
 0x8a1   :  { %1430 = vpow2.f32 %v1013_v10  ;;  %v1081_v3 = vsel %vm220_vm3, %v1076_v12, 0 }
 0x8a2   :  { %1380 = vmatpush3.bf16.msra.mxu1 %v1081_v3 }
 0x8ab   :  { %v1431_v6 = vpop.eup %1430 }
 0x8ac   :  { %v1017_v13 = vsel %vm97_vm2, %v1431_v6, 0.0  ;;  %v1025_v11 = vpack.c.bf16 %v1431_v6, %v1431_v6 }
 0x8ad   :  { %1018 = vadd.xlane.f32.xlu1 %v1017_v13 }
 0x8e7   :  { %v1010_v15 = vpop.xlane.xlu0 %1009 }
 0x8e8   :  { %v1012_v16 = vsub.f32 %v999_v2, %v1010_v15 }
 0x8ea   :  { %v1015_v17 = vmul.f32 1.442695, %v1012_v16 }
 0x8eb   :  { %v1028_v18 = vpop.permute.xlu0 %1027 }
 0x8ec   :  { %1432 = vpow2.f32 %v1015_v17  ;;  %v1033_v19 = vsel %vm220_vm3, %v1028_v18, 0 }
 0x8ed   :  { %1374 = vmatpush3.bf16.msra.mxu0 %v1033_v19 }
 0x8ee   :  { %1385 = vmatprep.subr.bf16.mxu0 %v1438_v0 }
 0x8f0   :  { %1376 = vmatmul.mubr.msk.bf16.vlgmr.msra.gmra.mrb[36].mxu0 %vm97_vm2, %v1025_v11 }
 0x8f1   :  { %1387 = vmatprep.mubr.msk.bf16.mxu0 %vm1439_vm0, %v1438_v0  ;;  %1386 = vmatpush3.bf16.msra.mxu0 %v1132_v24 }
 0x8f6   :  { %v1433_v20 = vpop.eup %1432 }
 0x8f7   :  { %v1020_v21 = vsel %vm97_vm2, %v1433_v20, 0.0  ;;  %v1026_v22 = vpack.c.bf16 %v1433_v20, %v1433_v20 }
 0x8f8   :  { %1021 = vadd.xlane.f32.xlu0 %v1020_v21 }
 0x8f9   :  { %1382 = vmatmul.mubr.msk.bf16.vlgmr.msra.gmra.mrb[36].mxu1 %vm97_vm2, %v1026_v22 }
 0x93a   :  { %v1019_v25 = vpop.xlane.xlu1 %1018 }
 0x93b   :  { %1434 = vrcp.f32 %v1019_v25 }
 0x945   :  { %v1435_v30 = vpop.eup %1434 }
 0x985   :  { %v1022_v26 = vpop.xlane.xlu0 %1021 }
 0x986   :  { %1436 = vrcp.f32 %v1022_v26 }
 0x990   :  { %v1437_v31 = vpop.eup %1436 }
 0x9c3   :  { %v1069_v27 = vpop.f32.mrb[36].mxu0 }
 0x9c4   :  { %v1377_v0 = vpop.f32.mrb[37].mxu0  ;;  %v1123_v33 = vmul.f32 %v1435_v30, %v1069_v27 }
 0x9c5   :  { %v1072_v28 = vpop.f32.mrb[38].mxu0 }
 0x9c6   :  { %v1378_v29 = vpop.f32.mrb[39].mxu0 }
 0x9cc   :  { %v1117_v32 = vpop.f32.mrb[36].mxu1 }
 0x9cd   :  { %v1124_v34 = vmul.f32 %v1437_v31, %v1117_v32  ;;  %v1383_v35 = vpop.f32.mrb[37].mxu1 }
 0x9ce   :  { %v1120_v36 = vpop.f32.mrb[38].mxu1 }
 0x9cf   :  { %v1125_v37 = vpack.c.bf16 %v1124_v34, %v1123_v33  ;;  %v1384_v38 = vpop.f32.mrb[39].mxu1 }
 0x9d1   :  { %1388 = vmatmul.mubr.msk.bf16.vlgmr.msra.gmra.mrb[40].mxu0 %vm97_vm2, %v1125_v37 }
 0xaa4   :  { %v1168_v39 = vpop.f32.mrb[40].mxu0 }
 0xaa5   :  { %v1175_v41 = vadd.f32 %v1168_v39, %v903_v60  ;;  %v1389_v42 = vpop.f32.mrb[41].mxu0 }
 0xaa6   :  { %v1171_v43 = vpop.f32.mrb[42].mxu0 }
 0xaa7   :  { %v1184_v44 = vadd.f32 %v1219_v40, %v1175_v41  ;;  %v1176_v45 = vadd.f32 %v1171_v43, %v1655_v63  ;;  %v1390_v46 = vpop.f32.mrb[43].mxu0 }
 0xaa9   :  { %1186 = vst.msk [vmem:[%s1690_s5] sm:$0xff] %vm47_vm1, %v1184_v44  ;;  %v1185_v47 = vadd.f32 %v1219_v40, %v1176_v45 }
 0xaab   :  { %1187 = vst.msk [vmem:[%s1690_s5 + $0x8] sm:$0xff] %vm47_vm1, %v1185_v47 }

</bundles_post_ra>
